<compile_context>
chip_gen: v7x
topology: tpu7x:2x2x1
jax: 0.10.0
libtpu: 0.0.40
codegen_flags: <defaults>
</compile_context>

<pallas_src>
import math

import jax
import jax.numpy as jnp
from jax.experimental import pallas as pl
from jax.experimental.pallas import tpu as pltpu


_LANE = 128                 # TPU vreg lane width
_MAX_FOLDED_LANES = 1024    # don't fold channel-rows past ~1k lanes
_MiB = 1024 * 1024


def _chip_config():
    """Per-generation tuning table.

    Returns (target per-step HBM traffic in+out bytes, scoped-VMEM default,
             physical VMEM bytes, minimum desired grid steps)."""
    try:
        kind = jax.devices()[0].device_kind.lower()
    except Exception:  # pragma: no cover - defensive
        kind = ""
    if "v7" in kind or "7x" in kind:
        # ~3.2 TB/s per TC: ~8 MiB in + 8 MiB out per step keeps the ~0.35 us
        # step overhead <10%.  64 MiB physical VMEM / 32 MiB scoped default;
        # 2 TensorCores -> keep >= 8 grid steps for megacore sharding.
        return 16 * _MiB, 32 * _MiB, 64 * _MiB, 8
    if "v6" in kind:
        # ~1.3-1.4 TB/s: 4 MiB in + 4 MiB out; double-buffered ~16 MiB stays
        # under the 32 MiB scoped default (no flag needed).
        return 8 * _MiB, 32 * _MiB, 128 * _MiB, 4
    if "v5" in kind:
        # ~0.82 TB/s (v5e): 2-3 MiB tiles already amortize the overhead, and
        # the scoped default is only 16 MiB, so stay small.
        return 5 * _MiB, 16 * _MiB, 128 * _MiB, 4
    # Unknown generation (v4, emulator, ...): conservative defaults.
    return 4 * _MiB, 16 * _MiB, 64 * _MiB, 4


def _rescale_kernel(w_ref, x_ref, o_ref):
    # w_ref: (1, L)          resident per-lane weight row (constant index_map)
    # x_ref: (TILE_ROWS, L)  one row tile
    # o_ref: (TILE_ROWS, L)
    x = x_ref[...].astype(jnp.float32)
    w = w_ref[...].astype(jnp.float32)   # sublane broadcast is free on the VPU
    o_ref[...] = (x * w).astype(o_ref.dtype)


def rescale(x: jax.Array, weight: jax.Array, *, out_dtype=None,
            donate_x: bool = False) -> jax.Array:
    """weight * x with weight of shape (1, 1, C) and x of shape (..., C).

    out_dtype: optional override (e.g. bf16 output for bf16 activations
        instead of torch-style promotion to f32) — halves HBM write traffic.
        Default matches torch type promotion.
    donate_x: alias the output onto x's buffer (only applied when dtypes
        match); use together with jax.jit(..., donate_argnums=...).
    """
    orig_shape = x.shape
    C = orig_shape[-1]
    assert weight.shape == (1, 1, C), f"weight must be (1,1,{C})"

    if out_dtype is None:
        out_dtype = jnp.result_type(x.dtype, weight.dtype)   # torch promotion
    out_dtype = jnp.dtype(out_dtype)

    R = x.size // C                       # total channel-rows (leading dims)

    # ---- lane-dense folding: fold k consecutive channel-rows per lane row ----
    if C % _LANE == 0:
        k = 1                             # already lane-aligned
    else:
        k = _LANE // math.gcd(C, _LANE)   # smallest k with (k*C) % 128 == 0
        if R % k == 0:
            # Grow toward ~1024 lanes while divisibility holds.
            while (2 * k * C) <= _MAX_FOLDED_LANES and R % (2 * k) == 0:
                k *= 2
        else:
            # TODO(synk): a prefix/tail split would keep >99% of rows on the
            # lane-dense path, but stitching the two outputs back together in
            # JAX (concatenate / pad / slice around the pallas_calls) costs a
            # full extra HBM pass, roughly as expensive as the masked-store
            # penalty it avoids.  The real fix is fusing this multiply into an
            # adjacent kernel; until then use the (correct) masked-store path.
            k = 1
    L = k * C
    Rp = R // k

    x2 = x.reshape(Rp, L)                              # free contiguous reshape
    w_row = jnp.tile(weight.reshape(1, C), (1, k))     # (1, L) — tiny, built once

    # ---- generation-aware row-tile sizing (amortize ~0.35 us/step) ----
    target_traffic, scoped_default, physical_vmem, min_steps = _chip_config()
    bytes_per_row = L * (x2.dtype.itemsize + out_dtype.itemsize)   # in + out

    if Rp <= 8:
        tile_rows = Rp                    # full extent satisfies (8,128) rule
    else:
        tile_rows = min(Rp, max(1, target_traffic // bytes_per_row))
        tile_rows = max(8, (tile_rows // 8) * 8)        # multiple of 8 sublanes
        # Never let one double-buffered (in+out) step overflow physical VMEM.
        max_step_bytes = max(8 * bytes_per_row, (physical_vmem - 16 * _MiB) // 2)
        max_rows_fit = max(8, ((max_step_bytes // bytes_per_row) // 8) * 8)
        tile_rows = min(tile_rows, max_rows_fit)
        # Keep at least `min_steps` grid steps when the tensor is big enough,
        # so both v7x TensorCores get work and the DMA pipeline overlaps.
        if Rp >= min_steps * 8:
            tile_rows = min(tile_rows, max(8, ((Rp // min_steps) // 8) * 8))
        tile_rows = min(tile_rows, Rp)
        # Prefer a multiple-of-8 divisor of Rp near the target so the final
        # grid step is not a mostly-padded partial block.
        if Rp % tile_rows != 0:
            d = tile_rows
            lo = max(8, tile_rows // 2)
            while d >= lo:
                if Rp % d == 0:
                    tile_rows = d
                    break
                d -= 8

    grid = (pl.cdiv(Rp, tile_rows),)

    # Double-buffered in+out tiles + resident weight row, with headroom.
    step_bytes = tile_rows * bytes_per_row
    vmem_needed = 2 * step_bytes + 2 * L * w_row.dtype.itemsize + _MiB
    vmem_limit = None
    if vmem_needed > (3 * scoped_default) // 4:
        vmem_limit = max(scoped_default,
                         min(int(vmem_needed * 1.25), physical_vmem - 8 * _MiB))

    call_kwargs = {}
    if donate_x and out_dtype == x2.dtype:
        call_kwargs["input_output_aliases"] = {1: 0}    # x2 is operand index 1

    out2 = pl.pallas_call(
        _rescale_kernel,
        out_shape=jax.ShapeDtypeStruct((Rp, L), out_dtype),
        grid_spec=pltpu.PrefetchScalarGridSpec(
            num_scalar_prefetch=0,
            grid=grid,
            in_specs=[
                # weight row: same block every step -> DMA'd once, stays resident
                pl.BlockSpec((1, L), lambda i: (0, 0)),
                # x: one lane-dense row tile per grid step
                pl.BlockSpec((tile_rows, L), lambda i: (i, 0)),
            ],
            out_specs=pl.BlockSpec((tile_rows, L), lambda i: (i, 0)),
        ),
        compiler_params=pltpu.CompilerParams(
            # Independent row tiles -> shard the grid across TensorCores (v7x).
            dimension_semantics=("parallel",),
            vmem_limit_bytes=vmem_limit,
        ),
        **call_kwargs,
    )(w_row, x2)

    return out2.reshape(orig_shape)


if __name__ == "__main__":
    key = jax.random.PRNGKey(0)
    k_w, k_x, k_y, k_z = jax.random.split(key, 4)

    # Shapes consistent with the module's (batch, seq, channels) usage.
    B, S, C = 2, 8, 32
    x = jax.random.normal(k_x, (B, S, C), dtype=jnp.float32)

    # Deterministic parameter init, exactly as in __init__: torch.ones(1,1,C).
    weight = jnp.ones((1, 1, C), dtype=jnp.float32)
    out = rescale(x, weight)
    jax.block_until_ready(out)
    ref = weight * x
    assert out.shape == ref.shape and out.dtype == ref.dtype
    assert jnp.allclose(out, ref, atol=0, rtol=0)

    # Non-trivial weight (f32 path is exact).
    weight2 = jax.random.normal(k_w, (1, 1, C), dtype=jnp.float32)
    out2 = rescale(x, weight2)
    assert jnp.allclose(out2, weight2 * x, rtol=1e-6, atol=1e-6)

    # bf16 activations with f32 weight (torch-style promotion -> f32 output).
    xb = x.astype(jnp.bfloat16)
    out3 = rescale(xb, weight2)
    ref3 = weight2 * xb
    assert out3.dtype == ref3.dtype
    assert jnp.allclose(out3, ref3, rtol=1e-6, atol=1e-6)

    # bf16 output override (halves HBM write traffic for bf16 consumers).
    out4 = rescale(xb, weight2, out_dtype=jnp.bfloat16)
    assert out4.dtype == jnp.bfloat16
    assert jnp.allclose(out4.astype(jnp.float32),
                        (weight2 * xb).astype(jnp.float32),
                        rtol=1e-2, atol=1e-2)

    # Fallback path: C not 128-aligned and row count not divisible by k_min.
    x5 = jax.random.normal(k_y, (3, 5, 24), dtype=jnp.float32)
    w5 = jax.random.normal(k_z, (1, 1, 24), dtype=jnp.float32)
    out5 = rescale(x5, w5)
    assert jnp.allclose(out5, w5 * x5, rtol=1e-6, atol=1e-6)

    # Donated-input path (output aliases x's buffer).
    f_donate = jax.jit(lambda xx: rescale(xx, weight2, donate_x=True),
                       donate_argnums=0)
    out6 = f_donate(jnp.array(x))
    assert jnp.allclose(out6, weight2 * x, rtol=1e-6, atol=1e-6)

    jax.block_until_ready((out, out2, out3, out4, out5, out6))
    print("KERNEL_OK")
</pallas_src>

<mosaic_0001>
module attributes {stable_mosaic.version = 11 : i64} {
  func.func @_rescale_kernel(%arg0: i32, %arg1: memref<1x512xf32, #tpu.memory_space<vmem>>, %arg2: memref<1x512xf32, #tpu.memory_space<vmem>>, %arg3: memref<1x512xf32, #tpu.memory_space<vmem>>) attributes {dimension_semantics = [#tpu.dimension_semantics<parallel>], iteration_bounds = array<i64: 1>, scalar_prefetch = 0 : i64, scratch_operands = 0 : i64, tpu.core_type = #tpu.core_type<tc>, window_params = [{pipeline_mode = #tpu.pipeline_mode<synchronous>, transform_indices = @transform_0, window_bounds = array<i64: 1, 512>}, {transform_indices = @transform_1, window_bounds = array<i64: 1, 512>}, {transform_indices = @transform_2, window_bounds = array<i64: 1, 512>}]} {
    %c0 = arith.constant 0 : index
    %c0_0 = arith.constant 0 : index
    %0 = vector.load %arg2[%c0, %c0_0] : memref<1x512xf32, #tpu.memory_space<vmem>>, vector<1x512xf32>
    %c0_1 = arith.constant 0 : index
    %c0_2 = arith.constant 0 : index
    %1 = vector.load %arg1[%c0_1, %c0_2] : memref<1x512xf32, #tpu.memory_space<vmem>>, vector<1x512xf32>
    %2 = arith.mulf %0, %1 : vector<1x512xf32>
    %c0_3 = arith.constant 0 : index
    %c0_4 = arith.constant 0 : index
    %3 = vector.load %arg3[%c0_3, %c0_4] : memref<1x512xf32, #tpu.memory_space<vmem>>, vector<1x512xf32>
    tpu.vector_store %arg3[%c0_3, %c0_4], %2 {strides = array<i32>} : memref<1x512xf32, #tpu.memory_space<vmem>>, vector<1x512xf32>,
    return
  }
  func.func @transform_0(%arg0: i32) -> (i32, i32) {
    %c0_i32 = arith.constant 0 : i32
    %c0_i32_0 = arith.constant 0 : i32
    %c0_i32_1 = arith.constant 0 : i32
    return %c0_i32, %c0_i32_0 : i32, i32
  }
  func.func @transform_1(%arg0: i32) -> (i32, i32) {
    %c0_i32 = arith.constant 0 : i32
    %c0_i32_0 = arith.constant 0 : i32
    return %arg0, %c0_i32 : i32, i32
  }
  func.func @transform_2(%arg0: i32) -> (i32, i32) {
    %c0_i32 = arith.constant 0 : i32
    %c0_i32_0 = arith.constant 0 : i32
    return %arg0, %c0_i32 : i32, i32
  }
}

</mosaic_0001>

<bundles_post_ra>
// kernel: tpu_custom_call.1
= control target key start
LH: loop header
LB: loop body
LE: loop exit
PB: predicated region body
PF: predicated region fallthrough
CT: control target
= control target key end

     0   :  { %7 = vsyncpa [#allocation3], 0  ;;  %s189_s0 = inlined_call_operand.hbm [shape: f32[1,512], index: 0, kind: input, shape index: {}]   ;;  %s190_s1 = inlined_call_operand.hbm [shape: f32[1,512], index: 1, kind: input, shape index: {}]   ;;  %s191_s2 = inlined_call_operand.hbm [shape: f32[1,512], index: 2, kind: output, shape index: {}]  }
   0x1   :  { %8 = vsyncpa [#allocation6], 0 }
   0x2   :  { %9 = vsyncpa [#allocation4], 0  ;;  %s135_s9 = smov [#allocation2]   ;;  %s136_s11 = smov [#allocation5]  }
   0x3   :  { %s16_s10 = sshll.u32 %s135_s9, 4  ;;  %s26_s12 = sshll.u32 %s136_s11, 4  ;;  %s17_s10 = int_to_ptr.vmem [resolvable:$true] %s16_s10  ;;  %s27_s12 = int_to_ptr.vmem [resolvable:$true] %s26_s12 }
   0x4   :  { %s63_s15 = scalar_lea.hbm %s189_s0, 64 }
   0x5   :  { %p64_p0 = scmp.ne.s32.totalorder %s189_s0, %s63_s15  ;;  %p67_p1 = scmp.lt.u32.totalorder %s63_s15, %s189_s0 }
   0x7   :  { %p69_p2 = pnand %p67_p1, %p64_p0 }
   0x9   :  { %72 = shalt.err (!%p69_p2)
}
   0xa   :  { %s73_s20 = scalar_lea.vmem %s17_s10, 64  ;;  %p78_p4 = scmp.lt.s32.totalorder %s17_s10, %s17_s10 }
   0xb   :  { %p74_p3 = scmp.ne.s32.totalorder %s17_s10, %s73_s20  ;;  %p79_p5 = scmp.lt.s32.totalorder %s73_s20, %s73_s20 }
   0xd   :  { %p80_p6 = por %p79_p5, %p78_p4 }
   0xf   :  { %p81_p7 = pnand %p80_p6, %p74_p3 }
  0x11   :  { %84 = shalt.err (!%p81_p7)
}
  0x12   :  { %19 = dma.hbm_to_vmem [thread:$0]  %s189_s0, 64, %s17_s10, [#allocation3]  }
  0x13   :  { %s85_s25 = scalar_lea.hbm %s190_s1, 64 }
  0x14   :  { %p86_p8 = scmp.ne.s32.totalorder %s190_s1, %s85_s25  ;;  %p89_p9 = scmp.lt.u32.totalorder %s85_s25, %s190_s1 }
  0x16   :  { %p91_p10 = pnand %p89_p9, %p86_p8 }
  0x18   :  { %94 = shalt.err (!%p91_p10)
}
  0x19   :  { %s95_s30 = scalar_lea.vmem %s27_s12, 64  ;;  %p100_p12 = scmp.lt.s32.totalorder %s27_s12, %s27_s12 }
  0x1a   :  { %p96_p11 = scmp.ne.s32.totalorder %s27_s12, %s95_s30  ;;  %p101_p13 = scmp.lt.s32.totalorder %s95_s30, %s95_s30 }
  0x1c   :  { %p102_p0 = por %p101_p13, %p100_p12 }
  0x1e   :  { %p103_p1 = pnand %p102_p0, %p96_p11 }
  0x20   :  { %106 = shalt.err (!%p103_p1)
}
  0x21   :  { %29 = dma.hbm_to_vmem [thread:$0]  %s190_s1, 64, %s27_s12, [#allocation6]  }
  0x22   :  { %129 = dma.done.wait [#allocation3], 64  }
  0x23   :  { %130 = vsyncadd [#allocation3], 4294967232 }
  0x24   :  { %131 = dma.done.wait [#allocation6], 64  }
  0x25   :  { %132 = vsyncadd [#allocation6], 4294967232  ;;  %v39_v0 = vlaneseq  ;;  %s137_s4 = smov [#allocation7]   ;;  %v36_v1 = vld [vmem:[#allocation5] sm:$0xf] }
  0x26   :  { %s50_s5 = sshll.u32 %s137_s4, 4  ;;  %v37_v2 = vld [vmem:[#allocation2] sm:$0xf]  ;;  %s51_s5 = int_to_ptr.vmem [resolvable:$true] %s50_s5 }
  0x27   :  { %vm41_vm0 = vcmp.lt.s32.totalorder %v39_v0, 512  ;;  %v38_v3 = vmul.f32 %v37_v2, %v36_v1  ;;  %s107_s6 = scalar_lea.vmem %s51_s5, 64  ;;  %p112_p3 = scmp.lt.s32.totalorder %s51_s5, %s51_s5 }
  0x28   :  { %p108_p2 = scmp.ne.s32.totalorder %s51_s5, %s107_s6  ;;  %p113_p4 = scmp.lt.s32.totalorder %s107_s6, %s107_s6 }
  0x29   :  { %43 = vst.msk [vmem:[#allocation7] sm:$0xf] %vm41_vm0, %v38_v3 }
  0x2a   :  { %p114_p5 = por %p113_p4, %p112_p3 }
  0x2c   :  { %p115_p6 = pnand %p114_p5, %p108_p2 }
  0x2e   :  { %118 = shalt.err (!%p115_p6)
}
  0x2f   :  { %s119_s8 = scalar_lea.hbm %s191_s2, 64 }
  0x30   :  { %p120_p7 = scmp.ne.s32.totalorder %s191_s2, %s119_s8  ;;  %p123_p8 = scmp.lt.u32.totalorder %s119_s8, %s191_s2 }
  0x32   :  { %p125_p9 = pnand %p123_p8, %p120_p7 }
  0x34   :  { %128 = shalt.err (!%p125_p9)
}
  0x35   :  { %53 = dma.vmem_to_hbm [thread:$0]  %s51_s5, 64, %s191_s2, [#allocation4]  }
  0x36   :  { %133 = dma.done.wait [#allocation4], 64  }
  0x37   :  { %134 = vsyncadd [#allocation4], 4294967232 }
  0x38   :  { %57 = vsyncpa [#allocation3], 1 }
  0x39   :  { %58 = vsyncpa [#allocation6], 1 }
  0x3a   :  { %59 = vsyncpa [#allocation4], 1 }

</bundles_post_ra>
